<compile_context>
chip_gen: v7x
topology: tpu7x:2x2x1
jax: 0.10.0
libtpu: 0.0.40
codegen_flags: <defaults>
</compile_context>

<pallas_src>
import math
import functools

import jax
import jax.numpy as jnp
from jax.experimental import pallas as pl
from jax.experimental.pallas import tpu as pltpu


def mlp_kernel(x_ref, w1_ref, b1_ref, w2_ref, b2_ref, o_ref, acc_ref):
    k = pl.program_id(2)

    @pl.when(k == 0)
    def _init():
        # Fold the output bias into the accumulator init (once per (i, j) tile).
        acc_ref[...] = jnp.broadcast_to(b2_ref[...], acc_ref.shape).astype(jnp.float32)

    # fc1 + ReLU on this hidden slab (f32 MXU accumulation, f32 bias/ReLU on VPU).
    h = jnp.dot(x_ref[...], w1_ref[...], preferred_element_type=jnp.float32)
    h = jnp.maximum(h + b1_ref[...], 0.0)

    # fc2 partial product for this hidden slab, accumulated in VMEM scratch.
    acc_ref[...] += jnp.dot(h.astype(w2_ref.dtype), w2_ref[...],
                            preferred_element_type=jnp.float32)

    @pl.when(k == pl.num_programs(2) - 1)
    def _finalize():
        o_ref[...] = acc_ref[...].astype(o_ref.dtype)


# ----------------------------------------------------------------------------
# Trace-time helpers (all shapes are static under jit).
# ----------------------------------------------------------------------------
def _round_up(a, b):
    return -(-a // b) * b


def _vmem_cap_bytes():
    """~75% of physical VMEM: 96 MiB on v5e/v6e (128 MiB), 48 MiB on v7x (64 MiB).
    Leaves headroom for Mosaic internal scratch/semaphores. Fallback: 48 MiB."""
    phys = None
    try:
        info = pltpu.get_tpu_info()
        phys = int(getattr(info, "vmem_capacity_bytes"))
    except Exception:
        phys = None
    if not phys:
        phys = 64 << 20
    return max(32 << 20, (phys * 3) // 4)


def _pick_tile(dim, max_tile, align):
    """Smallest tile count covering `dim` with tile <= max_tile (tile a multiple of
    `align`); minimizes padding. Returns (tile, padded_dim = n_tiles * tile)."""
    max_tile = max(align, min(max_tile, _round_up(max(dim, 1), align)))
    n = -(-dim // max_tile)
    tile = _round_up(-(-dim // n), align)
    return tile, n * tile


def _footprint_bytes(tile_m, tile_h, tile_n, d_in_p, bpe_c, bpe_o):
    """Double-buffered VMEM working set (bias blocks padded to 8 sublanes)."""
    per_step = (
        tile_m * d_in_p * bpe_c      # x tile
        + d_in_p * tile_h * bpe_c    # w1 slab
        + 8 * tile_h * 4             # b1 slab (f32, 8 sublanes)
        + tile_h * tile_n * bpe_c    # w2 slab
        + 8 * tile_n * 4             # b2 slab (f32, 8 sublanes)
        + tile_m * tile_n * bpe_o    # out tile
    )
    acc = tile_m * tile_n * 4        # f32 accumulator scratch (single buffer)
    return 2 * per_step + acc


def _pad_to(a, shape, dtype):
    """Zero-pad/cast `a` to (shape, dtype). No copy when already conforming, so
    aligned weights are passed straight through (no per-call HBM traffic)."""
    if a.dtype != dtype:
        a = a.astype(dtype)
    if a.shape == tuple(shape):
        return a
    return jnp.zeros(shape, dtype).at[tuple(slice(0, s) for s in a.shape)].set(a)


# ----------------------------------------------------------------------------
# Forward wrapper.
# ----------------------------------------------------------------------------
@functools.partial(jax.jit, static_argnames=("tile_m_max", "tile_h_max",
                                             "tile_n_max", "compute_dtype"))
def mlp_forward(x, w1, b1, w2, b2, *, tile_m_max=512, tile_h_max=512,
                tile_n_max=2048, compute_dtype=None):
    """relu(x @ w1 + b1) @ w2 + b2.

    x: [..., D_in], w1: [D_in, H], b1: [H] or [1,H], w2: [H, D_out], b2: [D_out] or [1,D_out].
    compute_dtype: matmul operand dtype (e.g. jnp.bfloat16 for ~2-4x MXU throughput
    and half the weight DMA; accumulation stays f32). Defaults to x.dtype so the
    default path matches the PyTorch module's f32 numerics.
    """
    lead = x.shape[:-1]
    D_in = x.shape[-1]
    x2 = x.reshape(-1, D_in)
    M = x2.shape[0]
    H = w1.shape[1]
    D_out = w2.shape[1]
    out_dtype = x.dtype
    cdt = jnp.dtype(compute_dtype) if compute_dtype is not None else jnp.dtype(x.dtype)

    b1 = b1.reshape(1, H)
    b2 = b2.reshape(1, D_out)

    # ---- tile selection --------------------------------------------------------
    d_in_p = _round_up(D_in, 128)
    h_p = _round_up(H, 128)
    d_out_p = _round_up(D_out, 128)

    bpe_c = cdt.itemsize
    bpe_o = jnp.dtype(out_dtype).itemsize
    cap = _vmem_cap_bytes()

    tile_n, d_out_pad = _pick_tile(d_out_p, tile_n_max, 128)
    tile_m, m_pad = _pick_tile(M, tile_m_max, 8)

    # Keep the full weight set VMEM-resident (single k step) when it fits: with
    # constant index maps Pallas never re-streams W1/W2 across batch tiles.
    if _footprint_bytes(tile_m, h_p, tile_n, d_in_p, bpe_c, bpe_o) <= cap:
        tile_h, h_pad = h_p, h_p
    else:
        tile_h, h_pad = _pick_tile(h_p, tile_h_max, 128)

    # Shrink until the double-buffered working set fits the VMEM budget.
    while _footprint_bytes(tile_m, tile_h, tile_n, d_in_p, bpe_c, bpe_o) > cap:
        if tile_m > 256:
            tile_m, m_pad = _pick_tile(M, tile_m // 2, 8)
        elif tile_h > 128:
            tile_h, h_pad = _pick_tile(h_p, tile_h // 2, 128)
        elif tile_n > 128:
            tile_n, d_out_pad = _pick_tile(d_out_p, tile_n // 2, 128)
        elif tile_m > 8:
            tile_m, m_pad = _pick_tile(M, tile_m // 2, 8)
        else:
            break  # minimal tiling; hand to the compiler as-is

    grid = (m_pad // tile_m, d_out_pad // tile_n, h_pad // tile_h)

    # ---- pad operands (no-op when already aligned) -----------------------------
    xp = _pad_to(x2, (m_pad, d_in_p), cdt)
    w1p = _pad_to(w1, (d_in_p, h_pad), cdt)
    b1p = _pad_to(b1, (1, h_pad), jnp.float32)
    w2p = _pad_to(w2, (h_pad, d_out_pad), cdt)
    b2p = _pad_to(b2, (1, d_out_pad), jnp.float32)

    out_p = pl.pallas_call(
        mlp_kernel,
        out_shape=jax.ShapeDtypeStruct((m_pad, d_out_pad), out_dtype),
        grid=grid,
        in_specs=[
            pl.BlockSpec((tile_m, d_in_p), lambda i, j, k: (i, 0)),    # x
            pl.BlockSpec((d_in_p, tile_h), lambda i, j, k: (0, k)),    # w1
            pl.BlockSpec((1, tile_h),      lambda i, j, k: (0, k)),    # b1
            pl.BlockSpec((tile_h, tile_n), lambda i, j, k: (k, j)),    # w2
            pl.BlockSpec((1, tile_n),      lambda i, j, k: (0, j)),    # b2
        ],
        out_specs=pl.BlockSpec((tile_m, tile_n), lambda i, j, k: (i, j)),
        scratch_shapes=[pltpu.VMEM((tile_m, tile_n), jnp.float32)],
        compiler_params=pltpu.CompilerParams(
            dimension_semantics=("parallel", "parallel", "arbitrary"),
            vmem_limit_bytes=int(cap),
        ),
    )(xp, w1p, b1p, w2p, b2p)

    return out_p[:M, :D_out].reshape(*lead, D_out)


# ----------------------------------------------------------------------------
# Reference + init (PyTorch nn.Linear default init, weight stored [in, out]).
# ----------------------------------------------------------------------------
def init_linear(key, fan_in, fan_out, dtype=jnp.float32):
    bound = 1.0 / math.sqrt(fan_in)
    kw, kb = jax.random.split(key)
    w = jax.random.uniform(kw, (fan_in, fan_out), dtype, minval=-bound, maxval=bound)
    b = jax.random.uniform(kb, (1, fan_out), dtype, minval=-bound, maxval=bound)
    return w, b


def mlp_ref(x, w1, b1, w2, b2):
    return jnp.maximum(x @ w1 + b1, 0.0) @ w2 + b2


if __name__ == "__main__":
    key = jax.random.PRNGKey(0)

    # --- small shapes matching the module spec (f32 path) ----------------------
    input_size, hidden_size, output_size, batch = 32, 64, 16, 8
    kx, k1, k2, kbig = jax.random.split(key, 4)
    x = jax.random.normal(kx, (batch, input_size), jnp.float32)
    w1, b1 = init_linear(k1, input_size, hidden_size)
    w2, b2 = init_linear(k2, hidden_size, output_size)

    out = mlp_forward(x, w1, b1, w2, b2)
    jax.block_until_ready(out)
    ref = mlp_ref(x, w1, b1, w2, b2)
    assert out.shape == (batch, output_size)
    assert jnp.allclose(out, ref, atol=1e-5, rtol=1e-5)

    # --- larger check: exercises padding-minimizing tiling + resident weights ---
    kx2, k3, k4 = jax.random.split(kbig, 3)
    M2, Din2, H2, Dout2 = 300, 200, 640, 96
    x2 = jax.random.normal(kx2, (M2, Din2), jnp.float32)
    w1b, b1b = init_linear(k3, Din2, H2)
    w2b, b2b = init_linear(k4, H2, Dout2)

    out2 = mlp_forward(x2, w1b, b1b, w2b, b2b)
    jax.block_until_ready(out2)
    ref2 = mlp_ref(x2, w1b, b1b, w2b, b2b)
    assert out2.shape == (M2, Dout2)
    assert jnp.allclose(out2, ref2, atol=2e-4, rtol=2e-4)

    # --- bf16 compute path (f32 accumulation), looser tolerance ----------------
    out_bf16 = mlp_forward(x2, w1b, b1b, w2b, b2b, compute_dtype=jnp.bfloat16)
    jax.block_until_ready(out_bf16)
    ref_bf16 = mlp_ref(x2.astype(jnp.bfloat16).astype(jnp.float32),
                       w1b.astype(jnp.bfloat16).astype(jnp.float32), b1b,
                       w2b.astype(jnp.bfloat16).astype(jnp.float32), b2b)
    assert jnp.allclose(out_bf16, ref_bf16, atol=5e-2, rtol=5e-2)

    print("KERNEL_OK")
</pallas_src>

<mosaic_0001>
module attributes {stable_mosaic.version = 11 : i64} {
  func.func @mlp_kernel(%arg0: i32, %arg1: i32, %arg2: i32, %arg3: memref<8x128xf32, #tpu.memory_space<vmem>>, %arg4: memref<128x128xf32, #tpu.memory_space<vmem>>, %arg5: memref<1x128xf32, #tpu.memory_space<vmem>>, %arg6: memref<128x128xf32, #tpu.memory_space<vmem>>, %arg7: memref<1x128xf32, #tpu.memory_space<vmem>>, %arg8: memref<8x128xf32, #tpu.memory_space<vmem>>, %arg9: memref<8x128xf32, #tpu.memory_space<vmem>>) attributes {dimension_semantics = [#tpu.dimension_semantics<parallel>, #tpu.dimension_semantics<parallel>, #tpu.dimension_semantics<arbitrary>], iteration_bounds = array<i64: 1, 1, 1>, scalar_prefetch = 0 : i64, scratch_operands = 1 : i64, tpu.core_type = #tpu.core_type<tc>, window_params = [{transform_indices = @transform_0, window_bounds = array<i64: 8, 128>}, {transform_indices = @transform_1, window_bounds = array<i64: 128, 128>}, {transform_indices = @transform_2, window_bounds = array<i64: 1, 128>}, {transform_indices = @transform_3, window_bounds = array<i64: 128, 128>}, {transform_indices = @transform_4, window_bounds = array<i64: 1, 128>}, {transform_indices = @transform_5, window_bounds = array<i64: 8, 128>}]} {
    %c0_i32 = arith.constant 0 : i32
    %0 = arith.cmpi eq, %arg2, %c0_i32 : i32
    %1 = arith.extui %0 : i1 to i32
    %c0_i32_0 = arith.constant 0 : i32
    %2 = arith.cmpi ne, %1, %c0_i32_0 : i32
    scf.if %2 {
      %c0_16 = arith.constant 0 : index
      %c0_17 = arith.constant 0 : index
      %19 = vector.load %arg7[%c0_16, %c0_17] : memref<1x128xf32, #tpu.memory_space<vmem>>, vector<1x128xf32>
      %20 = vector.shape_cast %19 : vector<1x128xf32> to vector<1x128xf32>
      %21 = vector.broadcast %20 : vector<1x128xf32> to vector<8x128xf32>
      %c0_18 = arith.constant 0 : index
      %c0_19 = arith.constant 0 : index
      %22 = vector.load %arg9[%c0_18, %c0_19] : memref<8x128xf32, #tpu.memory_space<vmem>>, vector<8x128xf32>
      tpu.vector_store %arg9[%c0_18, %c0_19], %21 {strides = array<i32>} : memref<8x128xf32, #tpu.memory_space<vmem>>, vector<8x128xf32>,
    } else {
    }
    %c0 = arith.constant 0 : index
    %c0_1 = arith.constant 0 : index
    %3 = vector.load %arg3[%c0, %c0_1] : memref<8x128xf32, #tpu.memory_space<vmem>>, vector<8x128xf32>
    %c0_2 = arith.constant 0 : index
    %c0_3 = arith.constant 0 : index
    %4 = vector.load %arg4[%c0_2, %c0_3] : memref<128x128xf32, #tpu.memory_space<vmem>>, vector<128x128xf32>
    %cst = arith.constant dense<0.000000e+00> : vector<8x128xf32>
    %5 = tpu.matmul %3, %4, %cst {dimension_numbers = #tpu.dot_dimension_numbers<[1], [0], [0], [1], [0, 0, 1, 1], [], []>} : vector<8x128xf32>, vector<128x128xf32>, vector<8x128xf32> -> vector<8x128xf32>
    %c0_4 = arith.constant 0 : index
    %c0_5 = arith.constant 0 : index
    %6 = vector.load %arg5[%c0_4, %c0_5] : memref<1x128xf32, #tpu.memory_space<vmem>>, vector<1x128xf32>
    %7 = vector.broadcast %6 : vector<1x128xf32> to vector<8x128xf32>
    %8 = arith.addf %5, %7 : vector<8x128xf32>
    %cst_6 = arith.constant 0.000000e+00 : f32
    %9 = vector.broadcast %cst_6 : f32 to vector<8x128xf32>
    %10 = arith.maximumf %8, %9 : vector<8x128xf32>
    %c0_7 = arith.constant 0 : index
    %c0_8 = arith.constant 0 : index
    %11 = vector.load %arg9[%c0_7, %c0_8] : memref<8x128xf32, #tpu.memory_space<vmem>>, vector<8x128xf32>
    %c0_9 = arith.constant 0 : index
    %c0_10 = arith.constant 0 : index
    %12 = vector.load %arg6[%c0_9, %c0_10] : memref<128x128xf32, #tpu.memory_space<vmem>>, vector<128x128xf32>
    %cst_11 = arith.constant dense<0.000000e+00> : vector<8x128xf32>
    %13 = tpu.matmul %10, %12, %cst_11 {dimension_numbers = #tpu.dot_dimension_numbers<[1], [0], [0], [1], [0, 0, 1, 1], [], []>} : vector<8x128xf32>, vector<128x128xf32>, vector<8x128xf32> -> vector<8x128xf32>
    %14 = arith.addf %11, %13 : vector<8x128xf32>
    %c0_12 = arith.constant 0 : index
    %c0_13 = arith.constant 0 : index
    %15 = vector.load %arg9[%c0_12, %c0_13] : memref<8x128xf32, #tpu.memory_space<vmem>>, vector<8x128xf32>
    tpu.vector_store %arg9[%c0_12, %c0_13], %14 {strides = array<i32>} : memref<8x128xf32, #tpu.memory_space<vmem>>, vector<8x128xf32>,
    %c0_i32_14 = arith.constant 0 : i32
    %16 = arith.cmpi eq, %arg2, %c0_i32_14 : i32
    %17 = arith.extui %16 : i1 to i32
    %c0_i32_15 = arith.constant 0 : i32
    %18 = arith.cmpi ne, %17, %c0_i32_15 : i32
    scf.if %18 {
      %c0_16 = arith.constant 0 : index
      %c0_17 = arith.constant 0 : index
      %19 = vector.load %arg9[%c0_16, %c0_17] : memref<8x128xf32, #tpu.memory_space<vmem>>, vector<8x128xf32>
      %c0_18 = arith.constant 0 : index
      %c0_19 = arith.constant 0 : index
      %20 = vector.load %arg8[%c0_18, %c0_19] : memref<8x128xf32, #tpu.memory_space<vmem>>, vector<8x128xf32>
      tpu.vector_store %arg8[%c0_18, %c0_19], %19 {strides = array<i32>} : memref<8x128xf32, #tpu.memory_space<vmem>>, vector<8x128xf32>,
    } else {
    }
    return
  }
  func.func @transform_0(%arg0: i32, %arg1: i32, %arg2: i32) -> (i32, i32) {
    %c0_i32 = arith.constant 0 : i32
    %c0_i32_0 = arith.constant 0 : i32
    return %arg0, %c0_i32 : i32, i32
  }
  func.func @transform_1(%arg0: i32, %arg1: i32, %arg2: i32) -> (i32, i32) {
    %c0_i32 = arith.constant 0 : i32
    %c0_i32_0 = arith.constant 0 : i32
    return %c0_i32, %arg2 : i32, i32
  }
  func.func @transform_2(%arg0: i32, %arg1: i32, %arg2: i32) -> (i32, i32) {
    %c0_i32 = arith.constant 0 : i32
    %c0_i32_0 = arith.constant 0 : i32
    return %c0_i32, %arg2 : i32, i32
  }
  func.func @transform_3(%arg0: i32, %arg1: i32, %arg2: i32) -> (i32, i32) {
    %c0_i32 = arith.constant 0 : i32
    return %arg2, %arg1 : i32, i32
  }
  func.func @transform_4(%arg0: i32, %arg1: i32, %arg2: i32) -> (i32, i32) {
    %c0_i32 = arith.constant 0 : i32
    %c0_i32_0 = arith.constant 0 : i32
    return %c0_i32, %arg1 : i32, i32
  }
  func.func @transform_5(%arg0: i32, %arg1: i32, %arg2: i32) -> (i32, i32) {
    %c0_i32 = arith.constant 0 : i32
    return %arg0, %arg1 : i32, i32
  }
}

</mosaic_0001>

<bundles_post_ra>
// kernel: mlp_forward.1
= control target key start
LH: loop header
LB: loop body
LE: loop exit
PB: predicated region body
PF: predicated region fallthrough
CT: control target
= control target key end

     0   :  { %v418_v3 = vmov 0.0|0.0   ;;  %vm419_vm0 = vmmov 0   ;;  %v420_v6 = vmov 0.0   ;;  %s585_s0 = inlined_call_operand.vmem [shape: f32[8,128], index: 0, kind: input, shape index: {}]   ;;  %s586_s1 = inlined_call_operand.vmem [shape: f32[128,128], index: 1, kind: input, shape index: {}]   ;;  %s587_s2 = inlined_call_operand.vmem [shape: f32[1,128], index: 2, kind: input, shape index: {}]   ;;  %s588_s3 = inlined_call_operand.vmem [shape: f32[128,128], index: 3, kind: input, shape index: {}]   ;;  %s589_s4 = inlined_call_operand.vmem [shape: f32[1,128], index: 4, kind: input, shape index: {}]   ;;  %s590_s5 = inlined_call_operand.hbm [shape: f32[8,128], index: 5, kind: output, shape index: {}]  }
   0x1   :  { %v34_v0 = vld [vmem:[%s586_s1] sm:$0xff]  ;;  %v35_v1 = vld [vmem:[%s586_s1 + $0x8] sm:$0xff]  ;;  %v36_v2 = vld [vmem:[%s586_s1 + $0x10] sm:$0xff]  ;;  %342 = vmatprep.subr.bf16.mxu0 %v418_v3  ;;  %304 = vmatprep.mubr.msk.f32.mxu0 %vm419_vm0, %v420_v6 }
   0x2   :  { %v343_v4 = vpack.c.bf16 %v35_v1, %v34_v0  ;;  %v37_v5 = vld [vmem:[%s586_s1 + $0x18] sm:$0xff]  ;;  %366 = vmatprep.subr.bf16.mxu1 %v418_v3  ;;  %339 = vmatprep.mubr.msk.f32.mxu1 %vm419_vm0, %v420_v6  ;;  %v38_v8 = vld [vmem:[%s586_s1 + $0x20] sm:$0xff]  ;;  %v39_v9 = vld [vmem:[%s586_s1 + $0x28] sm:$0xff] }
   0x3   :  { %v346_v7 = vpack.c.bf16 %v37_v5, %v36_v2  ;;  %v129_v10 = vld [vmem:[%s588_s3] sm:$0xff]  ;;  %v130_v11 = vld [vmem:[%s588_s3 + $0x8] sm:$0xff]  ;;  %v131_v12 = vld [vmem:[%s588_s3 + $0x10] sm:$0xff]  ;;  %v349_v14 = vpack.c.bf16 %v39_v9, %v38_v8 }
   0x4   :  { %344 = vmatpush3.bf16.msra.mxu0 %v343_v4  ;;  %v132_v13 = vld [vmem:[%s588_s3 + $0x18] sm:$0xff]  ;;  %v367_v15 = vpack.c.bf16 %v130_v11, %v129_v10  ;;  %v40_v16 = vld [vmem:[%s586_s1 + $0x30] sm:$0xff]  ;;  %v133_v19 = vld [vmem:[%s588_s3 + $0x20] sm:$0xff] }
   0x5   :  { %345 = vmatprep.subr.bf16.mxu0 %v418_v3  ;;  %v41_v17 = vld [vmem:[%s586_s1 + $0x38] sm:$0xff]  ;;  %v370_v18 = vpack.c.bf16 %v132_v13, %v131_v12  ;;  %v134_v20 = vld [vmem:[%s588_s3 + $0x28] sm:$0xff] }
   0x6   :  { %368 = vmatpush3.bf16.msra.mxu1 %v367_v15 }
   0x7   :  { %369 = vmatprep.subr.bf16.mxu1 %v418_v3 }
   0x8   :  { %347 = vmatpush3.bf16.msra.mxu0 %v346_v7 }
   0x9   :  { %348 = vmatprep.subr.bf16.mxu0 %v418_v3 }
   0xa   :  { %10 = vsyncpa [#allocation4], 0  ;;  %v352_v21 = vpack.c.bf16 %v41_v17, %v40_v16  ;;  %v42_v22 = vld [vmem:[%s586_s1 + $0x40] sm:$0xff]  ;;  %v43_v23 = vld [vmem:[%s586_s1 + $0x48] sm:$0xff]  ;;  %371 = vmatpush3.bf16.msra.mxu1 %v370_v18  ;;  %v373_v24 = vpack.c.bf16 %v134_v20, %v133_v19  ;;  %s421_s11 = smov [#allocation3]  }
   0xb   :  { %372 = vmatprep.subr.bf16.mxu1 %v418_v3  ;;  %v135_v25 = vld [vmem:[%s588_s3 + $0x30] sm:$0xff]  ;;  %v136_v26 = vld [vmem:[%s588_s3 + $0x38] sm:$0xff]  ;;  %v355_v27 = vpack.c.bf16 %v43_v23, %v42_v22  ;;  %v137_v31 = vld [vmem:[%s588_s3 + $0x40] sm:$0xff]  ;;  %s228_s12 = sshll.u32 %s421_s11, 4  ;;  %s229_s12 = int_to_ptr.vmem [resolvable:$true] %s228_s12 }
   0xc   :  { %350 = vmatpush3.bf16.msra.mxu0 %v349_v14  ;;  %v44_v28 = vld [vmem:[%s586_s1 + $0x50] sm:$0xff]  ;;  %v45_v29 = vld [vmem:[%s586_s1 + $0x58] sm:$0xff]  ;;  %v376_v30 = vpack.c.bf16 %v136_v26, %v135_v25  ;;  %v138_v32 = vld [vmem:[%s588_s3 + $0x48] sm:$0xff]  ;;  %p399_p1 = scmp.lt.s32.totalorder %s229_s12, %s229_s12 }
   0xd   :  { %351 = vmatprep.subr.bf16.mxu0 %v418_v3  ;;  %v358_v33 = vpack.c.bf16 %v45_v29, %v44_v28  ;;  %v46_v34 = vld [vmem:[%s586_s1 + $0x60] sm:$0xff]  ;;  %v47_v35 = vld [vmem:[%s586_s1 + $0x68] sm:$0xff]  ;;  %v379_v36 = vpack.c.bf16 %v138_v32, %v137_v31  ;;  %v139_v37 = vld [vmem:[%s588_s3 + $0x50] sm:$0xff] }
   0xe   :  { %374 = vmatpush3.bf16.msra.mxu1 %v373_v24  ;;  %v140_v38 = vld [vmem:[%s588_s3 + $0x58] sm:$0xff]  ;;  %v361_v39 = vpack.c.bf16 %v47_v35, %v46_v34  ;;  %v48_v40 = vld [vmem:[%s586_s1 + $0x70] sm:$0xff]  ;;  %v141_v43 = vld [vmem:[%s588_s3 + $0x60] sm:$0xff] }
   0xf   :  { %375 = vmatprep.subr.bf16.mxu1 %v418_v3  ;;  %v49_v41 = vld [vmem:[%s586_s1 + $0x78] sm:$0xff]  ;;  %v382_v42 = vpack.c.bf16 %v140_v38, %v139_v37  ;;  %v142_v44 = vld [vmem:[%s588_s3 + $0x68] sm:$0xff]  ;;  %v33_v47 = vld [vmem:[%s585_s0] sm:$0xff] }
  0x10   :  { %353 = vmatpush3.bf16.msra.mxu0 %v352_v21  ;;  %v364_v45 = vpack.c.bf16 %v49_v41, %v48_v40  ;;  %v385_v46 = vpack.c.bf16 %v142_v44, %v141_v43  ;;  %v143_v48 = vld [vmem:[%s588_s3 + $0x70] sm:$0xff]  ;;  %v144_v49 = vld [vmem:[%s588_s3 + $0x78] sm:$0xff]  ;;  %v237_v51 = vld [vmem:[%s587_s2] ss:$0 sm:$0xff]  ;;  %s394_s3 = scalar_lea.vmem %s229_s12, 128 }
  0x11   :  { %354 = vmatprep.subr.bf16.mxu0 %v418_v3  ;;  %v388_v50 = vpack.c.bf16 %v144_v49, %v143_v48  ;;  %v236_v56 = vld [vmem:[%s589_s4] ss:$0 sm:$0xff]  ;;  %p395_p0 = scmp.ne.s32.totalorder %s229_s12, %s394_s3  ;;  %p400_p2 = scmp.lt.s32.totalorder %s394_s3, %s394_s3 }
  0x12   :  { %377 = vmatpush3.bf16.msra.mxu1 %v376_v30 }
  0x13   :  { %378 = vmatprep.subr.bf16.mxu1 %v418_v3  ;;  %p401_p3 = por %p400_p2, %p399_p1 }
  0x14   :  { %356 = vmatpush3.bf16.msra.mxu0 %v355_v27 }
  0x15   :  { %357 = vmatprep.subr.bf16.mxu0 %v418_v3  ;;  %p402_p4 = pnand %p401_p3, %p395_p0 }
  0x16   :  { %380 = vmatpush3.bf16.msra.mxu1 %v379_v36 }
  0x17   :  { %381 = vmatprep.subr.bf16.mxu1 %v418_v3 }
  0x18   :  { %359 = vmatpush3.bf16.msra.mxu0 %v358_v33 }
  0x19   :  { %360 = vmatprep.subr.bf16.mxu0 %v418_v3 }
  0x1a   :  { %383 = vmatpush3.bf16.msra.mxu1 %v382_v42 }
  0x1b   :  { %384 = vmatprep.subr.bf16.mxu1 %v418_v3 }
  0x1c   :  { %362 = vmatpush3.bf16.msra.mxu0 %v361_v39 }
  0x1d   :  { %363 = vmatprep.subr.bf16.mxu0 %v418_v3 }
  0x1e   :  { %386 = vmatpush3.bf16.msra.mxu1 %v385_v46 }
  0x1f   :  { %387 = vmatprep.subr.bf16.mxu1 %v418_v3 }
  0x20   :  { %365 = vmatpush3.bf16.msra.mxu0 %v364_v45 }
  0x22   :  { %389 = vmatpush3.bf16.msra.mxu1 %v388_v50 }
  0x23   :  { %305 = vmatmul.mubr.f32.vlgmr.msra.gmra.mrb[0].mxu0 %v33_v47 }
  0xf6   :  { %v123_v52 = vpop.f32.mrb[0].mxu0 }
  0xf7   :  { %v124_v53 = vadd.f32 %v237_v51, %v123_v52  ;;  %v306_v54 = vpop.f32.mrb[1].mxu0 }
  0xf9   :  { %v127_v55 = vmax.f32 %v124_v53, 0.0 }
  0xfb   :  { %340 = vmatmul.mubr.f32.vlgmr.msra.gmra.mrb[0].mxu1 %v127_v55 }
 0x1ce   :  { %v211_v57 = vpop.f32.mrb[0].mxu1 }
 0x1cf   :  { %v215_v58 = vadd.f32 %v236_v56, %v211_v57  ;;  %v341_v59 = vpop.f32.mrb[1].mxu1 }
 0x1d1   :  { %221 = vst [vmem:[#allocation3] sm:$0xff] %v215_v58 }
 0x1d2   :  { %405 = shalt.err (!%p402_p4)
}
 0x1d3   :  { %s406_s14 = scalar_lea.hbm %s590_s5, 128 }
 0x1d4   :  { %p407_p5 = scmp.ne.s32.totalorder %s590_s5, %s406_s14  ;;  %p410_p6 = scmp.lt.u32.totalorder %s406_s14, %s590_s5 }
 0x1d6   :  { %p412_p7 = pnand %p410_p6, %p407_p5 }
 0x1d8   :  { %415 = shalt.err (!%p412_p7)
}
 0x1d9   :  { %231 = dma.vmem_to_hbm [thread:$0]  %s229_s12, 128, %s590_s5, [#allocation4]  }
 0x1da   :  { %416 = dma.done.wait [#allocation4], 128  }
 0x1db   :  { %417 = vsyncadd [#allocation4], 4294967168 }
 0x1dc   :  { %235 = vsyncpa [#allocation4], 1 }

</bundles_post_ra>
